<compile_context>
chip_gen: v6e
topology: v6e:2x2x1
jax: 0.10.0
libtpu: 0.0.40
codegen_flags: <defaults>
</compile_context>

<pallas_src>
import math

import jax
import jax.numpy as jnp
from jax.experimental import pallas as pl
from jax.experimental.pallas import tpu as pltpu

_CHUNK_LANES = 4096                    # in-kernel compute chunk (bounds VMEM temporaries)
_INPUT_VMEM_BUDGET = 12 * (1 << 20)    # per-step input bytes (x+t+m), single-buffered


def _make_kernel(tn, cw, n_valid, ragged):
    """Build the per-(R, tn)-block kernel.

    tn      : lanes per grid block (power-of-two multiple of 128)
    cw      : lanes per compute chunk (== tn when tn <= _CHUNK_LANES)
    n_valid : true width of the packed rows (<= num_tiles * tn)
    ragged  : statically True iff the last block overhangs the array
    """
    n_chunks = tn // cw

    def kernel(x_ref, t_ref, m_ref, o_ref):
        k = pl.program_id(1)

        @pl.when(k == 0)
        def _init():
            o_ref[...] = jnp.zeros_like(o_ref)

        rows = x_ref.shape[0]
        if ragged:
            lane = jax.lax.broadcasted_iota(jnp.int32, (rows, cw), 1)
            col_block = (pl.program_id(0) * pl.num_programs(1) + k) * tn
        else:
            col_block = 0

        def lane_fold(v):
            # (rows, cw) -> (rows, 128) halving tree of whole-lane-block VPU adds.
            w = v.shape[-1]
            while w > 128:
                h = w // 2
                v = v[:, :h] + v[:, h:]
                w = h
            return v

        def accumulate(xv, tv, mv, col0):
            x = xv.astype(jnp.float32)
            t = tv.astype(jnp.float32)
            m = mv.astype(jnp.float32)

            if ragged:
                # Zero out columns past the true row width (the overhanging part
                # of the last block holds unspecified VMEM contents).
                valid = (lane + col0) < n_valid
                x = jnp.where(valid, x, 0.0)
                t = jnp.where(valid, t, 0.0)
                m = jnp.where(valid, m, 0.0)

            # One exp shared between sigmoid and softplus: e = exp(-|x|).
            e = jnp.exp(-jnp.abs(x))
            one_pe = 1.0 + e
            # log(1 + e): abs error < 2^-24 (same rounding as the torch path's
            # own 1 - sigmoid); kept instead of log1p for lowering safety.
            sp = jnp.maximum(x, 0.0) + jnp.log(one_pe)          # softplus(x)
            r = pl.reciprocal(one_pe, approx=True)              # EUP slot, frees VALU
            r = r * (2.0 - one_pe * r)                          # one Newton step (f32)
            sig = jnp.where(x >= 0.0, r, e * r)                 # stable sigmoid(x)

            p = sig * m                                         # masked prediction
            tt = t * m                                          # masked target

            # BCE from logits with torch's -100 clamps; since m is {0,1}:
            #   -(m*(tt*log_sig + (1-tt)*log_1msig))
            #     == -(tt*log_sig + (m - tt)*log_1msig)
            log_sig = jnp.maximum(x - sp, -100.0)
            log_1msig = jnp.maximum(-sp, -100.0)
            bce = -(tt * log_sig + (m - tt) * log_1msig)

            o_ref[0] += lane_fold(p * tt)
            o_ref[1] += lane_fold(p * p)
            o_ref[2] += lane_fold(tt * tt)
            o_ref[3] += lane_fold(bce)

        if n_chunks == 1:
            accumulate(x_ref[...], t_ref[...], m_ref[...], col_block)
        else:
            @pl.loop(0, n_chunks)
            def _chunk(c):
                off = pl.multiple_of(c * cw, 128)
                sl = pl.ds(off, cw)
                accumulate(x_ref[:, sl], t_ref[:, sl], m_ref[:, sl],
                           col_block + c * cw)

    return kernel


def _choose_s_rows(B, n_cols, min_itemsize):
    """Sub-rows per batch row so R = B*s_rows fills whole vreg sublanes.

    s_rows must divide n_cols (so the (B, n) -> (R, n/s) reshape is a free
    contiguous re-view: no pad, no copy) and keep n_cols // s_rows >= 128.
    """
    sub_target = 8 * max(1, 4 // max(1, min_itemsize))   # 8 f32 / 16 bf16 / 32 int8
    s0 = 8 // math.gcd(B, 8)                             # smallest s with (B*s) % 8 == 0
    max_s = max(1, n_cols // 128)
    cap = max(sub_target, B * s0)
    best = 1
    j = 1
    while True:
        s = s0 * j
        if s > max_s or B * s > cap:
            break
        if n_cols % s == 0:
            best = s
        j += 1
    if best == 1 and s0 > 1:
        # No divisor of n_cols makes R a multiple of 8; fall back to any divisor
        # (the block still equals the full sublane extent, so it stays legal).
        for s in range(min(max_s, max(1, sub_target // B)), 1, -1):
            if n_cols % s == 0:
                best = s
                break
    return best


def _num_tensorcores():
    """Best-effort TensorCore count of the current chip (1 if unknown)."""
    try:
        info = pltpu.get_tpu_info()
    except Exception:
        return 1
    for name in ("num_cores", "core_count", "num_tensorcores",
                 "tensor_core_count", "cores_per_chip", "num_tensor_cores"):
        v = getattr(info, name, None)
        if isinstance(v, int) and 1 <= v <= 16:
            return v
    return 1


def bce_dice_loss(x, target, mask, weight=1.0, reduce=True):
    """Pallas implementation of BCE_DiceLoss.forward (mask assumed {0,1})."""
    B = x.shape[0]
    n_orig = math.prod(x.shape[1:])
    n_elems = B * n_orig                       # nn.BCELoss 'mean' denominator

    x2 = x.reshape(B, n_orig)
    t2 = target.reshape(B, n_orig)
    m2 = mask.reshape(B, n_orig)

    # Degenerate tiny inputs only: pad columns up to one lane tile (negligible).
    if n_orig < 128:
        pad = 128 - n_orig
        x2 = jnp.pad(x2, ((0, 0), (0, pad)))
        t2 = jnp.pad(t2, ((0, 0), (0, pad)))
        m2 = jnp.pad(m2, ((0, 0), (0, pad)))
    n_cols = max(n_orig, 128)

    itemsizes = (x2.dtype.itemsize, t2.dtype.itemsize, m2.dtype.itemsize)
    s_rows = _choose_s_rows(B, n_cols, min(itemsizes))
    R = B * s_rows
    n2 = n_cols // s_rows

    # Contiguous re-views: no HBM copy.
    xr = x2.reshape(R, n2)
    tr = t2.reshape(R, n2)
    mr = m2.reshape(R, n2)

    # Lane tile width: power-of-two multiple of 128, ~12 MiB of input per grid
    # step (24 MiB double-buffered) -- fits the raised scoped-VMEM limit on
    # v5e/v6e (128 MiB physical) and v7x (64 MiB per TC).
    sum_bytes = sum(itemsizes)
    tn = 128
    while tn < n2 and 2 * tn * R * sum_bytes <= _INPUT_VMEM_BUDGET:
        tn *= 2
    num_tiles = -(-n2 // tn)
    ragged = (num_tiles * tn != n2)
    vmem_limit = int(min(50 << 20,
                         max(16 << 20, 2 * R * tn * sum_bytes + (12 << 20))))

    # Two-TensorCore split only where it can actually engage (v7x); single-TC
    # chips keep a trivial leading axis (no wasted tile / extra accumulators).
    cores = _num_tensorcores()
    core_par = getattr(pltpu, "CORE_PARALLEL", None)
    arb = getattr(pltpu, "ARBITRARY", "arbitrary")
    num_par = 1
    if (cores >= 2 and core_par is not None
            and num_tiles >= cores and num_tiles % cores == 0):
        num_par = cores

    def call(npar, kin, dims):
        kernel = _make_kernel(tn, min(tn, _CHUNK_LANES), n2, ragged)
        in_spec = pl.BlockSpec((R, tn), lambda p, k: (0, p * kin + k))
        out_spec = pl.BlockSpec((None, 4, R, 128), lambda p, k: (p, 0, 0, 0))
        return pl.pallas_call(
            kernel,
            out_shape=jax.ShapeDtypeStruct((npar, 4, R, 128), jnp.float32),
            grid=(npar, kin),
            in_specs=[in_spec, in_spec, in_spec],
            out_specs=out_spec,
            compiler_params=pltpu.CompilerParams(
                dimension_semantics=dims,
                vmem_limit_bytes=vmem_limit),
        )(xr, tr, mr)

    if num_par > 1:
        try:
            o = jax.block_until_ready(
                call(num_par, num_tiles // num_par, (core_par, arb)))
        except Exception:
            # Conservative fallback: some chips / runtimes reject CORE_PARALLEL.
            o = call(1, num_tiles, ("arbitrary", "arbitrary"))
    else:
        o = call(1, num_tiles, ("arbitrary", "arbitrary"))

    # Tiny finalization in plain JAX: lanes -> scalars, sub-rows -> batch rows.
    lane_sums = o.sum(axis=(0, 3))                           # (4, R)
    per_batch = lane_sums.reshape(4, B, s_rows).sum(axis=2)  # (4, B)
    a = per_batch[0]
    b = per_batch[1] + 0.001
    c = per_batch[2] + 0.001
    dice_loss = 1.0 - 2.0 * a / (b + c)                      # (B,)
    bce_loss = jnp.sum(per_batch[3]) / float(n_elems)        # mean over B*N elems
    loss = weight * (bce_loss + dice_loss)
    return jnp.mean(loss) if reduce else loss


def _reference(x, target, mask, weight=1.0):
    """Pure-JAX reference mirroring the PyTorch module."""
    B = x.shape[0]
    p = jax.nn.sigmoid(x.reshape(B, -1).astype(jnp.float32))
    t = target.reshape(B, -1).astype(jnp.float32)
    m = mask.reshape(B, -1).astype(jnp.float32)
    p = p * m
    t = t * m
    a = jnp.sum(p * t, axis=1)
    b = jnp.sum(p * p, axis=1) + 0.001
    c = jnp.sum(t * t, axis=1) + 0.001
    dice = 1.0 - 2.0 * a / (b + c)
    log_p = jnp.maximum(jnp.log(p), -100.0)
    log_1mp = jnp.maximum(jnp.log(1.0 - p), -100.0)
    bce = jnp.mean(-(t * log_p + (1.0 - t) * log_1mp))
    return jnp.mean(weight * (bce + dice))


if __name__ == "__main__":
    key = jax.random.PRNGKey(0)

    def run_case(case_key, shape, dtype=jnp.float32, weight=1.0):
        k1, k2, k3 = jax.random.split(case_key, 3)
        x = jax.random.normal(k1, shape, dtype=jnp.float32).astype(dtype)
        target = (jax.random.uniform(k2, shape) > 0.5).astype(dtype)
        mask = (jax.random.uniform(k3, shape) > 0.3).astype(dtype)
        loss = jax.block_until_ready(bce_dice_loss(x, target, mask, weight))
        ref = _reference(x, target, mask, weight)
        assert jnp.allclose(loss, ref, rtol=1e-4, atol=1e-5), (shape, dtype, loss, ref)

    keys = jax.random.split(key, 5)
    run_case(keys[0], (2, 4, 16, 16))                 # small single tile, R = 8
    run_case(keys[1], (2, 64, 128, 128))              # multi-tile streaming, big blocks
    run_case(keys[2], (2, 3, 100, 100))               # ragged tail + in-kernel chunk loop
    run_case(keys[3], (3, 4, 16, 16))                 # B = 3 -> R = 24 sublane packing
    run_case(keys[4], (2, 8, 32, 32), jnp.bfloat16)   # narrow-dtype streaming, R = 16

    print("KERNEL_OK")
</pallas_src>

<mosaic_0001>
module attributes {stable_mosaic.version = 11 : i64} {
  func.func @kernel(%arg0: i32, %arg1: i32, %arg2: memref<8x256xf32, #tpu.memory_space<vmem>>, %arg3: memref<8x256xf32, #tpu.memory_space<vmem>>, %arg4: memref<8x256xf32, #tpu.memory_space<vmem>>, %arg5: memref<1x4x8x128xf32, #tpu.memory_space<vmem>>) attributes {dimension_semantics = [#tpu.dimension_semantics<arbitrary>, #tpu.dimension_semantics<arbitrary>], iteration_bounds = array<i64: 1, 1>, scalar_prefetch = 0 : i64, scratch_operands = 0 : i64, tpu.core_type = #tpu.core_type<tc>, window_params = [{transform_indices = @transform_0, window_bounds = array<i64: 8, 256>}, {transform_indices = @transform_1, window_bounds = array<i64: 8, 256>}, {transform_indices = @transform_2, window_bounds = array<i64: 8, 256>}, {transform_indices = @transform_3, window_bounds = array<i64: 1, 4, 8, 128>}]} {
    %c0_i32 = arith.constant 0 : i32
    %0 = arith.cmpi eq, %arg1, %c0_i32 : i32
    %1 = arith.extui %0 : i1 to i32
    %c0_i32_0 = arith.constant 0 : i32
    %2 = arith.cmpi ne, %1, %c0_i32_0 : i32
    scf.if %2 {
      %cst_43 = arith.constant 0.000000e+00 : f32
      %79 = vector.broadcast %cst_43 : f32 to vector<4x8x128xf32>
      %c0_44 = arith.constant 0 : index
      %c0_45 = arith.constant 0 : index
      %c0_46 = arith.constant 0 : index
      %c0_47 = arith.constant 0 : index
      %80 = vector.load %arg5[%c0_44, %c0_45, %c0_46, %c0_47] : memref<1x4x8x128xf32, #tpu.memory_space<vmem>>, vector<1x4x8x128xf32>
      %81 = vector.shape_cast %80 : vector<1x4x8x128xf32> to vector<4x8x128xf32>
      %82 = vector.shape_cast %79 : vector<4x8x128xf32> to vector<1x4x8x128xf32>
      tpu.vector_store %arg5[%c0_44, %c0_45, %c0_46, %c0_47], %82 {strides = array<i32>} : memref<1x4x8x128xf32, #tpu.memory_space<vmem>>, vector<1x4x8x128xf32>,
    } else {
    }
    %c0 = arith.constant 0 : index
    %c0_1 = arith.constant 0 : index
    %3 = vector.load %arg2[%c0, %c0_1] : memref<8x256xf32, #tpu.memory_space<vmem>>, vector<8x256xf32>
    %c0_2 = arith.constant 0 : index
    %c0_3 = arith.constant 0 : index
    %4 = vector.load %arg3[%c0_2, %c0_3] : memref<8x256xf32, #tpu.memory_space<vmem>>, vector<8x256xf32>
    %c0_4 = arith.constant 0 : index
    %c0_5 = arith.constant 0 : index
    %5 = vector.load %arg4[%c0_4, %c0_5] : memref<8x256xf32, #tpu.memory_space<vmem>>, vector<8x256xf32>
    %6 = math.absf %3 : vector<8x256xf32>
    %cst = arith.constant 0.000000e+00 : f32
    %7 = vector.broadcast %cst : f32 to vector<8x256xf32>
    %8 = arith.subf %7, %6 : vector<8x256xf32>
    %9 = math.exp %8 : vector<8x256xf32>
    %cst_6 = arith.constant 1.000000e+00 : f32
    %10 = vector.broadcast %cst_6 : f32 to vector<8x256xf32>
    %11 = arith.addf %10, %9 : vector<8x256xf32>
    %cst_7 = arith.constant 0.000000e+00 : f32
    %12 = vector.broadcast %cst_7 : f32 to vector<8x256xf32>
    %13 = arith.maximumf %3, %12 : vector<8x256xf32>
    %14 = math.log %11 : vector<8x256xf32>
    %15 = arith.addf %13, %14 : vector<8x256xf32>
    %16 = tpu.reciprocal %11 {approx = true} : vector<8x256xf32> -> vector<8x256xf32>
    %17 = arith.mulf %11, %16 : vector<8x256xf32>
    %cst_8 = arith.constant 2.000000e+00 : f32
    %18 = vector.broadcast %cst_8 : f32 to vector<8x256xf32>
    %19 = arith.subf %18, %17 : vector<8x256xf32>
    %20 = arith.mulf %16, %19 : vector<8x256xf32>
    %cst_9 = arith.constant 0.000000e+00 : f32
    %21 = vector.broadcast %cst_9 : f32 to vector<8x256xf32>
    %22 = arith.cmpf oge, %3, %21 : vector<8x256xf32>
    %23 = arith.mulf %9, %20 : vector<8x256xf32>
    %24 = arith.select %22, %20, %23 : vector<8x256xi1>, vector<8x256xf32>
    %25 = arith.mulf %24, %5 : vector<8x256xf32>
    %26 = arith.mulf %4, %5 : vector<8x256xf32>
    %27 = arith.subf %3, %15 : vector<8x256xf32>
    %cst_10 = arith.constant -1.000000e+02 : f32
    %28 = vector.broadcast %cst_10 : f32 to vector<8x256xf32>
    %29 = arith.maximumf %27, %28 : vector<8x256xf32>
    %cst_11 = arith.constant 0.000000e+00 : f32
    %30 = vector.broadcast %cst_11 : f32 to vector<8x256xf32>
    %31 = arith.subf %30, %15 : vector<8x256xf32>
    %cst_12 = arith.constant -1.000000e+02 : f32
    %32 = vector.broadcast %cst_12 : f32 to vector<8x256xf32>
    %33 = arith.maximumf %31, %32 : vector<8x256xf32>
    %34 = arith.mulf %26, %29 : vector<8x256xf32>
    %35 = arith.subf %5, %26 : vector<8x256xf32>
    %36 = arith.mulf %35, %33 : vector<8x256xf32>
    %37 = arith.addf %34, %36 : vector<8x256xf32>
    %cst_13 = arith.constant 0.000000e+00 : f32
    %38 = vector.broadcast %cst_13 : f32 to vector<8x256xf32>
    %39 = arith.subf %38, %37 : vector<8x256xf32>
    %c0_14 = arith.constant 0 : index
    %c0_15 = arith.constant 0 : index
    %c0_16 = arith.constant 0 : index
    %c0_17 = arith.constant 0 : index
    %40 = vector.load %arg5[%c0_14, %c0_15, %c0_16, %c0_17] : memref<1x4x8x128xf32, #tpu.memory_space<vmem>>, vector<1x1x8x128xf32>
    %41 = vector.shape_cast %40 : vector<1x1x8x128xf32> to vector<8x128xf32>
    %42 = arith.mulf %25, %26 : vector<8x256xf32>
    %43 = vector.extract_strided_slice %42 {offsets = [0, 0], sizes = [8, 128], strides = [1, 1]} : vector<8x256xf32> to vector<8x128xf32>
    %44 = vector.extract_strided_slice %42 {offsets = [0, 128], sizes = [8, 128], strides = [1, 1]} : vector<8x256xf32> to vector<8x128xf32>
    %45 = arith.addf %43, %44 : vector<8x128xf32>
    %46 = arith.addf %41, %45 : vector<8x128xf32>
    %c0_18 = arith.constant 0 : index
    %c0_19 = arith.constant 0 : index
    %c0_20 = arith.constant 0 : index
    %c0_21 = arith.constant 0 : index
    %47 = vector.load %arg5[%c0_18, %c0_19, %c0_20, %c0_21] : memref<1x4x8x128xf32, #tpu.memory_space<vmem>>, vector<1x1x8x128xf32>
    %48 = vector.shape_cast %47 : vector<1x1x8x128xf32> to vector<8x128xf32>
    %49 = vector.shape_cast %46 : vector<8x128xf32> to vector<1x1x8x128xf32>
    tpu.vector_store %arg5[%c0_18, %c0_19, %c0_20, %c0_21], %49 {strides = array<i32>} : memref<1x4x8x128xf32, #tpu.memory_space<vmem>>, vector<1x1x8x128xf32>,
    %c0_22 = arith.constant 0 : index
    %c1 = arith.constant 1 : index
    %c0_23 = arith.constant 0 : index
    %c0_24 = arith.constant 0 : index
    %50 = vector.load %arg5[%c0_22, %c1, %c0_23, %c0_24] : memref<1x4x8x128xf32, #tpu.memory_space<vmem>>, vector<1x1x8x128xf32>
    %51 = vector.shape_cast %50 : vector<1x1x8x128xf32> to vector<8x128xf32>
    %52 = arith.mulf %25, %25 : vector<8x256xf32>
    %53 = vector.extract_strided_slice %52 {offsets = [0, 0], sizes = [8, 128], strides = [1, 1]} : vector<8x256xf32> to vector<8x128xf32>
    %54 = vector.extract_strided_slice %52 {offsets = [0, 128], sizes = [8, 128], strides = [1, 1]} : vector<8x256xf32> to vector<8x128xf32>
    %55 = arith.addf %53, %54 : vector<8x128xf32>
    %56 = arith.addf %51, %55 : vector<8x128xf32>
    %c0_25 = arith.constant 0 : index
    %c1_26 = arith.constant 1 : index
    %c0_27 = arith.constant 0 : index
    %c0_28 = arith.constant 0 : index
    %57 = vector.load %arg5[%c0_25, %c1_26, %c0_27, %c0_28] : memref<1x4x8x128xf32, #tpu.memory_space<vmem>>, vector<1x1x8x128xf32>
    %58 = vector.shape_cast %57 : vector<1x1x8x128xf32> to vector<8x128xf32>
    %59 = vector.shape_cast %56 : vector<8x128xf32> to vector<1x1x8x128xf32>
    tpu.vector_store %arg5[%c0_25, %c1_26, %c0_27, %c0_28], %59 {strides = array<i32>} : memref<1x4x8x128xf32, #tpu.memory_space<vmem>>, vector<1x1x8x128xf32>,
    %c0_29 = arith.constant 0 : index
    %c2 = arith.constant 2 : index
    %c0_30 = arith.constant 0 : index
    %c0_31 = arith.constant 0 : index
    %60 = vector.load %arg5[%c0_29, %c2, %c0_30, %c0_31] : memref<1x4x8x128xf32, #tpu.memory_space<vmem>>, vector<1x1x8x128xf32>
    %61 = vector.shape_cast %60 : vector<1x1x8x128xf32> to vector<8x128xf32>
    %62 = arith.mulf %26, %26 : vector<8x256xf32>
    %63 = vector.extract_strided_slice %62 {offsets = [0, 0], sizes = [8, 128], strides = [1, 1]} : vector<8x256xf32> to vector<8x128xf32>
    %64 = vector.extract_strided_slice %62 {offsets = [0, 128], sizes = [8, 128], strides = [1, 1]} : vector<8x256xf32> to vector<8x128xf32>
    %65 = arith.addf %63, %64 : vector<8x128xf32>
    %66 = arith.addf %61, %65 : vector<8x128xf32>
    %c0_32 = arith.constant 0 : index
    %c2_33 = arith.constant 2 : index
    %c0_34 = arith.constant 0 : index
    %c0_35 = arith.constant 0 : index
    %67 = vector.load %arg5[%c0_32, %c2_33, %c0_34, %c0_35] : memref<1x4x8x128xf32, #tpu.memory_space<vmem>>, vector<1x1x8x128xf32>
    %68 = vector.shape_cast %67 : vector<1x1x8x128xf32> to vector<8x128xf32>
    %69 = vector.shape_cast %66 : vector<8x128xf32> to vector<1x1x8x128xf32>
    tpu.vector_store %arg5[%c0_32, %c2_33, %c0_34, %c0_35], %69 {strides = array<i32>} : memref<1x4x8x128xf32, #tpu.memory_space<vmem>>, vector<1x1x8x128xf32>,
    %c0_36 = arith.constant 0 : index
    %c3 = arith.constant 3 : index
    %c0_37 = arith.constant 0 : index
    %c0_38 = arith.constant 0 : index
    %70 = vector.load %arg5[%c0_36, %c3, %c0_37, %c0_38] : memref<1x4x8x128xf32, #tpu.memory_space<vmem>>, vector<1x1x8x128xf32>
    %71 = vector.shape_cast %70 : vector<1x1x8x128xf32> to vector<8x128xf32>
    %72 = vector.extract_strided_slice %39 {offsets = [0, 0], sizes = [8, 128], strides = [1, 1]} : vector<8x256xf32> to vector<8x128xf32>
    %73 = vector.extract_strided_slice %39 {offsets = [0, 128], sizes = [8, 128], strides = [1, 1]} : vector<8x256xf32> to vector<8x128xf32>
    %74 = arith.addf %72, %73 : vector<8x128xf32>
    %75 = arith.addf %71, %74 : vector<8x128xf32>
    %c0_39 = arith.constant 0 : index
    %c3_40 = arith.constant 3 : index
    %c0_41 = arith.constant 0 : index
    %c0_42 = arith.constant 0 : index
    %76 = vector.load %arg5[%c0_39, %c3_40, %c0_41, %c0_42] : memref<1x4x8x128xf32, #tpu.memory_space<vmem>>, vector<1x1x8x128xf32>
    %77 = vector.shape_cast %76 : vector<1x1x8x128xf32> to vector<8x128xf32>
    %78 = vector.shape_cast %75 : vector<8x128xf32> to vector<1x1x8x128xf32>
    tpu.vector_store %arg5[%c0_39, %c3_40, %c0_41, %c0_42], %78 {strides = array<i32>} : memref<1x4x8x128xf32, #tpu.memory_space<vmem>>, vector<1x1x8x128xf32>,
    return
  }
  func.func @transform_0(%arg0: i32, %arg1: i32) -> (i32, i32) {
    %c1_i32 = arith.constant 1 : i32
    %0 = arith.muli %arg0, %c1_i32 : i32
    %1 = arith.addi %0, %arg1 : i32
    %c0_i32 = arith.constant 0 : i32
    %c0_i32_0 = arith.constant 0 : i32
    return %c0_i32, %1 : i32, i32
  }
  func.func @transform_1(%arg0: i32, %arg1: i32) -> (i32, i32) {
    %c1_i32 = arith.constant 1 : i32
    %0 = arith.muli %arg0, %c1_i32 : i32
    %1 = arith.addi %0, %arg1 : i32
    %c0_i32 = arith.constant 0 : i32
    %c0_i32_0 = arith.constant 0 : i32
    return %c0_i32, %1 : i32, i32
  }
  func.func @transform_2(%arg0: i32, %arg1: i32) -> (i32, i32) {
    %c1_i32 = arith.constant 1 : i32
    %0 = arith.muli %arg0, %c1_i32 : i32
    %1 = arith.addi %0, %arg1 : i32
    %c0_i32 = arith.constant 0 : i32
    %c0_i32_0 = arith.constant 0 : i32
    return %c0_i32, %1 : i32, i32
  }
  func.func @transform_3(%arg0: i32, %arg1: i32) -> (i32, i32, i32, i32) {
    %c0_i32 = arith.constant 0 : i32
    %c0_i32_0 = arith.constant 0 : i32
    %c0_i32_1 = arith.constant 0 : i32
    %c0_i32_2 = arith.constant 0 : i32
    return %arg0, %c0_i32, %c0_i32_0, %c0_i32_1 : i32, i32, i32, i32
  }
}

</mosaic_0001>

<bundles_post_ra>
// kernel: tpu_custom_call.1
= control target key start
LH: loop header
LB: loop body
LE: loop exit
PB: predicated region body
PF: predicated region fallthrough
CT: control target
= control target key end

     0   :  { %8 = vsyncpa [#allocation3], 0  ;;  %s327_s0 = inlined_call_operand.hbm [shape: f32[8,256], index: 0, kind: input, shape index: {}]   ;;  %s328_s1 = inlined_call_operand.hbm [shape: f32[8,256], index: 1, kind: input, shape index: {}]   ;;  %s329_s2 = inlined_call_operand.hbm [shape: f32[8,256], index: 2, kind: input, shape index: {}]   ;;  %s330_s3 = inlined_call_operand.hbm [shape: f32[1,4,8,128], index: 3, kind: output, shape index: {}]  }
   0x1   :  { %9 = vsyncpa [#allocation6], 0 }
   0x2   :  { %10 = vsyncpa [#allocation4], 0  ;;  %s284_s12 = smov [#allocation5]   ;;  %s285_s14 = smov [#allocation2]  }
   0x3   :  { %s35_s13 = sshll.u32 %s284_s12, 4  ;;  %s21_s15 = sshll.u32 %s285_s14, 4  ;;  %s36_s13 = int_to_ptr.vmem [resolvable:$true] %s35_s13  ;;  %s22_s15 = int_to_ptr.vmem [resolvable:$true] %s21_s15 }
   0x4   :  { %s206_s16 = scalar_lea.vmem %s36_s13, 256  ;;  %p211_p1 = scmp.lt.s32.totalorder %s36_s13, %s36_s13 }
   0x5   :  { %p207_p0 = scmp.ne.s32.totalorder %s36_s13, %s206_s16  ;;  %p212_p2 = scmp.lt.s32.totalorder %s206_s16, %s206_s16 }
   0x7   :  { %p213_p3 = por %p212_p2, %p211_p1 }
   0x9   :  { %p214_p4 = pnand %p213_p3, %p207_p0 }
   0xb   :  { %217 = shalt.err (!%p214_p4)
}
   0xc   :  { %38 = dma.hbm_to_vmem [thread:$0]  %s328_s1, 256, %s36_s13, [#allocation6]  }
   0xd   :  { %s226_s19 = scalar_lea.vmem %s22_s15, 256  ;;  %p231_p6 = scmp.lt.s32.totalorder %s22_s15, %s22_s15 }
   0xe   :  { %p227_p5 = scmp.ne.s32.totalorder %s22_s15, %s226_s19  ;;  %p232_p7 = scmp.lt.s32.totalorder %s226_s19, %s226_s19 }
  0x10   :  { %p233_p8 = por %p232_p7, %p231_p6 }
  0x12   :  { %p234_p9 = pnand %p233_p8, %p227_p5 }
  0x14   :  { %237 = shalt.err (!%p234_p9)
}
  0x15   :  { %24 = dma.hbm_to_vmem [thread:$0]  %s327_s0, 256, %s22_s15, [#allocation3]  }
  0x16   :  { %s286_s22 = smov [#allocation7]  }
  0x17   :  { %s49_s23 = sshll.u32 %s286_s22, 4  ;;  %s50_s23 = int_to_ptr.vmem [resolvable:$true] %s49_s23 }
  0x18   :  { %s246_s24 = scalar_lea.vmem %s50_s23, 256  ;;  %p251_p11 = scmp.lt.s32.totalorder %s50_s23, %s50_s23 }
  0x19   :  { %p247_p10 = scmp.ne.s32.totalorder %s50_s23, %s246_s24  ;;  %p252_p12 = scmp.lt.s32.totalorder %s246_s24, %s246_s24 }
  0x1b   :  { %p253_p13 = por %p252_p12, %p251_p11 }
  0x1d   :  { %p254_p0 = pnand %p253_p13, %p247_p10 }
  0x1f   :  { %257 = shalt.err (!%p254_p0)
}
  0x20   :  { %52 = dma.hbm_to_vmem [thread:$0]  %s329_s2, 256, %s50_s23, [#allocation6]  }
  0x21   :  { %278 = dma.done.wait [#allocation3], 256  }
  0x22   :  { %279 = vsyncadd [#allocation3], 4294967040 }
  0x23   :  { %280 = dma.done.wait [#allocation6], 512  }
  0x24   :  { %281 = vsyncadd [#allocation6], 4294966784  ;;  %v76_v0 = vld [vmem:[#allocation2] sm:$0xff]  ;;  %v77_v1 = vld [vmem:[#allocation2 + $0x8] sm:$0xff]  ;;  %s287_s0 = smov [#allocation8]  }
  0x25   :  { %v78_v2 = vld [vmem:[#allocation5] sm:$0xff]  ;;  %v79_v3 = vld [vmem:[#allocation5 + $0x8] sm:$0xff]  ;;  %v80_v4 = vld [vmem:[#allocation7] sm:$0xff]  ;;  %v82_v6 = vand.u32 2147483647, %v76_v0  ;;  %v92_v24 = vmax.f32 %v76_v0, 0.0 }
  0x26   :  { %v319_v5 = vld [vmem:[#allocation7 + $0x8] sm:$0xff]  ;;  %v83_v7 = vand.u32 2147483647, %v77_v1  ;;  %v116_v8 = vmul.f32 %v80_v4, %v78_v2  ;;  %v93_v27 = vmax.f32 %v77_v1, 0.0  ;;  %vm108_vm0 = vcmp.ge.f32.partialorder %v76_v0, 0.0  ;;  %s166_s2 = sshll.u32 %s287_s0, 4  ;;  %s167_s2 = int_to_ptr.vmem [resolvable:$true] %s166_s2 }
  0x27   :  { %v117_v9 = vmul.f32 %v319_v5, %v79_v3  ;;  %v84_v10 = vsub.f32 0.0, %v82_v6  ;;  %vm109_vm1 = vcmp.ge.f32.partialorder %v77_v1, 0.0  ;;  %s258_s26 = scalar_lea.vmem %s167_s2, 512  ;;  %p263_p2 = scmp.lt.s32.totalorder %s167_s2, %s167_s2 }
  0x28   :  { %v85_v11 = vsub.f32 0.0, %v83_v7  ;;  %v151_v12 = vmul.f32 %v116_v8, %v116_v8  ;;  %v128_v40 = vsub.f32 %v80_v4, %v116_v8  ;;  %p259_p1 = scmp.ne.s32.totalorder %s167_s2, %s258_s26  ;;  %p264_p3 = scmp.lt.s32.totalorder %s258_s26, %s258_s26 }
  0x29   :  { %v152_v13 = vmul.f32 %v117_v9, %v117_v9  ;;  %v86_v14 = vmul.f32 1.442695, %v84_v10  ;;  %v129_v44 = vsub.f32 %v319_v5, %v117_v9 }
  0x2a   :  { %v88_v15 = vmul.f32 1.442695, %v85_v11  ;;  %p265_p4 = por %p264_p3, %p263_p2 }
  0x2b   :  { %v153_v16 = vadd.f32 %v152_v13, %v151_v12  ;;  %186 = vpow2.f32 %v86_v14 }
  0x2c   :  { %188 = vpow2.f32 %v88_v15  ;;  %p266_p5 = pnand %p265_p4, %p259_p1 }
  0x2d   :  { %155 = vst [vmem:[#allocation8 + $0x10] sm:$0xff] %v153_v16 }
  0x38   :  { %v187_v17 = vpop.eup %186 }
  0x39   :  { %v189_v18 = vpop.eup %188  ;;  %v90_v19 = vadd.f32 1.0, %v187_v17 }
  0x3a   :  { %v91_v20 = vadd.f32 1.0, %v189_v18 }
  0x3b   :  { %190 = vrcp.f32 %v90_v19 }
  0x3c   :  { %192 = vrcp.f32 %v91_v20 }
  0x3d   :  { %194 = vlog2.f32 %v90_v19 }
  0x3e   :  { %196 = vlog2.f32 %v91_v20 }
  0x48   :  { %v191_v21 = vpop.eup %190 }
  0x49   :  { %v193_v22 = vpop.eup %192  ;;  %v102_v23 = vmul.f32 %v191_v21, %v90_v19 }
  0x4a   :  { %v195_v25 = vpop.eup %194  ;;  %v103_v26 = vmul.f32 %v193_v22, %v91_v20 }
  0x4b   :  { %v197_v28 = vpop.eup %196  ;;  %v104_v29 = vsub.f32 2.0, %v102_v23  ;;  %v95_v30 = vmul.f32 0.6931472, %v195_v25 }
  0x4c   :  { %v105_v31 = vsub.f32 2.0, %v103_v26  ;;  %v97_v32 = vmul.f32 0.6931472, %v197_v28 }
  0x4d   :  { %v106_v33 = vmul.f32 %v191_v21, %v104_v29  ;;  %v98_v34 = vadd.f32 %v95_v30, %v92_v24 }
  0x4e   :  { %v107_v35 = vmul.f32 %v193_v22, %v105_v31  ;;  %v99_v36 = vadd.f32 %v97_v32, %v93_v27 }
  0x4f   :  { %v110_v37 = vmul.f32 %v187_v17, %v106_v33  ;;  %v118_v38 = vsub.f32 %v76_v0, %v98_v34  ;;  %v122_v39 = vsub.f32 0.0, %v98_v34 }
  0x50   :  { %v111_v41 = vmul.f32 %v189_v18, %v107_v35  ;;  %v119_v42 = vsub.f32 %v77_v1, %v99_v36  ;;  %v123_v43 = vsub.f32 0.0, %v99_v36 }
  0x51   :  { %v112_v45 = vsel %vm108_vm0, %v106_v33, %v110_v37  ;;  %v120_v46 = vmax.f32 %v118_v38, -100.0  ;;  %v124_v47 = vmax.f32 %v122_v39, -100.0 }
  0x52   :  { %v113_v48 = vsel %vm109_vm1, %v107_v35, %v111_v41  ;;  %v114_v49 = vmul.f32 %v112_v45, %v80_v4  ;;  %v121_v50 = vmax.f32 %v119_v42, -100.0  ;;  %v125_v51 = vmax.f32 %v123_v43, -100.0 }
  0x53   :  { %v115_v52 = vmul.f32 %v113_v48, %v319_v5  ;;  %v126_v53 = vmul.f32 %v120_v46, %v116_v8  ;;  %v130_v54 = vmul.f32 %v128_v40, %v124_v47 }
  0x54   :  { %v137_v55 = vmul.f32 %v116_v8, %v114_v49  ;;  %v144_v56 = vmul.f32 %v114_v49, %v114_v49  ;;  %v127_v57 = vmul.f32 %v121_v50, %v117_v9  ;;  %v131_v58 = vmul.f32 %v129_v44, %v125_v51 }
  0x55   :  { %v138_v59 = vmul.f32 %v117_v9, %v115_v52  ;;  %v145_v60 = vmul.f32 %v115_v52, %v115_v52  ;;  %v132_v61 = vadd.f32 %v130_v54, %v126_v53 }
  0x56   :  { %v133_v62 = vadd.f32 %v131_v58, %v127_v57 }
  0x57   :  { %v139_v63 = vadd.f32 %v138_v59, %v137_v55  ;;  %v146_v0 = vadd.f32 %v145_v60, %v144_v56  ;;  %v134_v1 = vsub.f32 0.0, %v132_v61 }
  0x58   :  { %v135_v2 = vsub.f32 0.0, %v133_v62 }
  0x59   :  { %141 = vst [vmem:[#allocation8] sm:$0xff] %v139_v63  ;;  %148 = vst [vmem:[#allocation8 + $0x8] sm:$0xff] %v146_v0 }
  0x5a   :  { %v158_v3 = vadd.f32 %v135_v2, %v134_v1 }
  0x5c   :  { %160 = vst [vmem:[#allocation8 + $0x18] sm:$0xff] %v158_v3 }
  0x5d   :  { %269 = shalt.err (!%p266_p5)
}
  0x5e   :  { %s288_s27 = smov 128   ;;  %s289_s28 = smov 8  }
  0x5f   :  { %172 = dma.vmem_to_hbm [thread:$0]  %s167_s2, 512, %s330_s3, [#allocation4], %s288_s27, %s288_s27, %s289_s28  }
  0x60   :  { %282 = dma.done.wait [#allocation4], 512  }
  0x61   :  { %283 = vsyncadd [#allocation4], 4294966784 }
  0x62   :  { %176 = vsyncpa [#allocation3], 1 }
  0x63   :  { %177 = vsyncpa [#allocation6], 1 }
  0x64   :  { %178 = vsyncpa [#allocation4], 1 }

</bundles_post_ra>
